<compile_context>
chip_gen: v7x
topology: tpu7x:2x2x1
jax: 0.10.0
libtpu: 0.0.40
codegen_flags: <defaults>
</compile_context>

<pallas_src>
import jax
import jax.numpy as jnp
from jax.experimental import pallas as pl
from jax.experimental.pallas import tpu as pltpu

PAIRWISE_EPS = 1e-6  # torch.nn.functional.pairwise_distance default eps


def _round_up(x, m):
    return ((x + m - 1) // m) * m


def _make_kernel(margin, b_true, tb):
    needs_tail_mask = (b_true % tb) != 0  # static: only mask when B doesn't divide evenly

    def kernel(x1_ref, x2_ref, lbl_ref, out_ref):
        # Inputs stream from HBM in native dtype; upcast per tile inside the kernel.
        x1 = x1_ref[...].astype(jnp.float32)                       # (TB, D)
        x2 = x2_ref[...].astype(jnp.float32)
        diff = x1 - x2 + PAIRWISE_EPS
        d2 = jnp.sum(diff * diff, axis=-1, keepdims=True)          # (TB, 1) == d^2
        d = jnp.sqrt(d2)                                           # euclidean distance
        lbl = lbl_ref[...].astype(jnp.float32)                     # (TB, 1)
        hinge = jnp.maximum(jnp.float32(margin) - d, 0.0)
        per_sample = lbl * d2 + (1.0 - lbl) * (hinge * hinge)      # (TB, 1)

        def store(vals):
            # Lane-dense (1, 8, 128) partial-sum block (wrapper reads [:, 0, 0]).
            out_ref[...] = jnp.broadcast_to(jnp.sum(vals), out_ref.shape)

        if needs_tail_mask:
            i = pl.program_id(0)
            is_last = i == pl.num_programs(0) - 1

            @pl.when(is_last)
            def _():
                # Garbage rows of the partial trailing block (incl. label garbage) are
                # removed by this select before they can reach the sum.
                row = jax.lax.broadcasted_iota(jnp.int32, per_sample.shape, 0) + i * tb
                store(jnp.where(row < b_true, per_sample, 0.0))

            @pl.when(jnp.logical_not(is_last))
            def _():
                store(per_sample)
        else:
            store(per_sample)

    return kernel


def _choose_tile_rows(B, D, itemsize):
    # VMEM lane padding: last dim is laid out in 128-wide lanes regardless of D.
    d_lane = _round_up(max(D, 1), 128)
    # Bytes per tile row:
    #   inputs:  2 arrays x 2 pipeline buffers x native itemsize
    #   temps:   ~16 B/element for the f32 upcasts / diff / diff^2 intermediates
    per_row = d_lane * (4 * itemsize + 16)
    budget = 24 * 1024 * 1024  # working-set budget, safe on v5e/v6e/v7x (<=~48 MiB total)
    tb = max(8, (budget // per_row) // 8 * 8)
    tb = min(tb, _round_up(B, 8))  # don't tile past the batch
    if B > 8:
        # Keep >= 2 tiles so the "parallel" grid axis can land on both v7x TensorCores.
        tb = min(tb, _round_up(pl.cdiv(B, 2), 8))
    return int(tb)


def contrastive_loss(img_1, img_2, label_1, *, margin=2.0, tile_rows=None):
    B, D = img_1.shape
    itemsize = jnp.dtype(img_1.dtype).itemsize

    if tile_rows is None:
        tb = _choose_tile_rows(B, D, itemsize)
    else:
        assert tile_rows % 8 == 0
        tb = tile_rows
    num_tiles = pl.cdiv(B, tb)

    lbl = label_1.reshape(B, 1)

    kernel = _make_kernel(float(margin), B, tb)
    partial = pl.pallas_call(
        kernel,
        out_shape=jax.ShapeDtypeStruct((num_tiles, 8, 128), jnp.float32),
        grid=(num_tiles,),
        in_specs=[
            pl.BlockSpec((tb, D), lambda i: (i, 0)),   # full (unpadded) feature dim
            pl.BlockSpec((tb, D), lambda i: (i, 0)),
            pl.BlockSpec((tb, 1), lambda i: (i, 0)),
        ],
        out_specs=pl.BlockSpec((1, 8, 128), lambda i: (i, 0, 0)),
        compiler_params=pltpu.CompilerParams(
            dimension_semantics=("parallel",),
            vmem_limit_bytes=48 * 1024 * 1024,
        ),
    )(img_1, img_2, lbl)
    # Final mean over the true batch size happens in the (trivial) XLA wrapper.
    return jnp.sum(partial[:, 0, 0]) / jnp.float32(B)


def _reference(img_1, img_2, label_1, margin=2.0):
    # Pure-JAX reference mirroring the PyTorch forward.
    d = jnp.sqrt(jnp.sum((img_1 - img_2 + PAIRWISE_EPS) ** 2, axis=-1))
    return jnp.mean(label_1 * d**2 + (1.0 - label_1) * jnp.maximum(margin - d, 0.0) ** 2)


if __name__ == "__main__":
    key = jax.random.PRNGKey(0)
    k1, k2, k3, k4, k5, k6 = jax.random.split(key, 6)

    # Case 1: small demo shapes (single tile, no tail mask).
    B, D = 8, 32
    img_1 = jax.random.normal(k1, (B, D), dtype=jnp.float32)
    img_2 = jax.random.normal(k2, (B, D), dtype=jnp.float32)
    label_1 = jax.random.bernoulli(k3, 0.5, (B,)).astype(jnp.float32)
    loss = jax.block_until_ready(contrastive_loss(img_1, img_2, label_1))
    ref = _reference(img_1, img_2, label_1)
    assert jnp.allclose(loss, ref, rtol=1e-5, atol=1e-5), (loss, ref)

    # Case 2: multi-tile grid + partial trailing block (explicit tile size).
    B2, D2 = 20, 40
    a = jax.random.normal(k4, (B2, D2), dtype=jnp.float32)
    b = jax.random.normal(k5, (B2, D2), dtype=jnp.float32)
    l = jax.random.bernoulli(k6, 0.5, (B2,)).astype(jnp.float32)
    loss2 = jax.block_until_ready(contrastive_loss(a, b, l, tile_rows=8))
    ref2 = _reference(a, b, l)
    assert jnp.allclose(loss2, ref2, rtol=1e-5, atol=1e-5), (loss2, ref2)

    # Case 3: same inputs through the automatic tile-size heuristic (2 tiles + tail mask).
    loss3 = jax.block_until_ready(contrastive_loss(a, b, l))
    assert jnp.allclose(loss3, ref2, rtol=1e-5, atol=1e-5), (loss3, ref2)

    print("KERNEL_OK")
</pallas_src>

<mosaic_0001>
module attributes {stable_mosaic.version = 11 : i64} {
  func.func @kernel(%arg0: i32, %arg1: memref<8x32xf32, #tpu.memory_space<vmem>>, %arg2: memref<8x32xf32, #tpu.memory_space<vmem>>, %arg3: memref<8x1xf32, #tpu.memory_space<vmem>>, %arg4: memref<1x8x128xf32, #tpu.memory_space<vmem>>) attributes {dimension_semantics = [#tpu.dimension_semantics<parallel>], iteration_bounds = array<i64: 1>, scalar_prefetch = 0 : i64, scratch_operands = 0 : i64, tpu.core_type = #tpu.core_type<tc>, window_params = [{transform_indices = @transform_0, window_bounds = array<i64: 8, 32>}, {transform_indices = @transform_1, window_bounds = array<i64: 8, 32>}, {transform_indices = @transform_2, window_bounds = array<i64: 8, 1>}, {transform_indices = @transform_3, window_bounds = array<i64: 1, 8, 128>}]} {
    %c0 = arith.constant 0 : index
    %c0_0 = arith.constant 0 : index
    %0 = vector.load %arg1[%c0, %c0_0] : memref<8x32xf32, #tpu.memory_space<vmem>>, vector<8x32xf32>
    %c0_1 = arith.constant 0 : index
    %c0_2 = arith.constant 0 : index
    %1 = vector.load %arg2[%c0_1, %c0_2] : memref<8x32xf32, #tpu.memory_space<vmem>>, vector<8x32xf32>
    %2 = arith.subf %0, %1 : vector<8x32xf32>
    %cst = arith.constant 9.99999997E-7 : f32
    %3 = vector.broadcast %cst : f32 to vector<8x32xf32>
    %4 = arith.addf %2, %3 : vector<8x32xf32>
    %5 = arith.mulf %4, %4 : vector<8x32xf32>
    %cst_3 = arith.constant dense<0.000000e+00> : vector<8xf32>
    %6 = vector.multi_reduction <add>, %5, %cst_3 [1] : vector<8x32xf32> to vector<8xf32>
    %7 = vector.shape_cast %6 : vector<8xf32> to vector<8x1xf32>
    %8 = math.sqrt %7 : vector<8x1xf32>
    %c0_4 = arith.constant 0 : index
    %c0_5 = arith.constant 0 : index
    %9 = vector.load %arg3[%c0_4, %c0_5] : memref<8x1xf32, #tpu.memory_space<vmem>>, vector<8x1xf32>
    %cst_6 = arith.constant 2.000000e+00 : f32
    %10 = vector.broadcast %cst_6 : f32 to vector<8x1xf32>
    %11 = arith.subf %10, %8 : vector<8x1xf32>
    %cst_7 = arith.constant 0.000000e+00 : f32
    %12 = vector.broadcast %cst_7 : f32 to vector<8x1xf32>
    %13 = arith.maximumf %11, %12 : vector<8x1xf32>
    %14 = arith.mulf %9, %7 : vector<8x1xf32>
    %cst_8 = arith.constant 1.000000e+00 : f32
    %15 = vector.broadcast %cst_8 : f32 to vector<8x1xf32>
    %16 = arith.subf %15, %9 : vector<8x1xf32>
    %17 = arith.mulf %13, %13 : vector<8x1xf32>
    %18 = arith.mulf %16, %17 : vector<8x1xf32>
    %19 = arith.addf %14, %18 : vector<8x1xf32>
    %20 = vector.shape_cast %19 : vector<8x1xf32> to vector<1x8x1xf32>
    %cst_9 = arith.constant dense<0.000000e+00> : vector<1xf32>
    %21 = vector.multi_reduction <add>, %20, %cst_9 [1, 2] : vector<1x8x1xf32> to vector<1xf32>
    %22 = vector.shape_cast %21 : vector<1xf32> to vector<1x1x1xf32>
    %23 = vector.extract %22[0, 0, 0] : f32 from vector<1x1x1xf32>
    %24 = vector.broadcast %23 : f32 to vector<1x8x128xf32>
    %c0_10 = arith.constant 0 : index
    %c0_11 = arith.constant 0 : index
    %c0_12 = arith.constant 0 : index
    %25 = vector.load %arg4[%c0_10, %c0_11, %c0_12] : memref<1x8x128xf32, #tpu.memory_space<vmem>>, vector<1x8x128xf32>
    tpu.vector_store %arg4[%c0_10, %c0_11, %c0_12], %24 {strides = array<i32>} : memref<1x8x128xf32, #tpu.memory_space<vmem>>, vector<1x8x128xf32>,
    return
  }
  func.func @transform_0(%arg0: i32) -> (i32, i32) {
    %c0_i32 = arith.constant 0 : i32
    %c0_i32_0 = arith.constant 0 : i32
    return %arg0, %c0_i32 : i32, i32
  }
  func.func @transform_1(%arg0: i32) -> (i32, i32) {
    %c0_i32 = arith.constant 0 : i32
    %c0_i32_0 = arith.constant 0 : i32
    return %arg0, %c0_i32 : i32, i32
  }
  func.func @transform_2(%arg0: i32) -> (i32, i32) {
    %c0_i32 = arith.constant 0 : i32
    %c0_i32_0 = arith.constant 0 : i32
    return %arg0, %c0_i32 : i32, i32
  }
  func.func @transform_3(%arg0: i32) -> (i32, i32, i32) {
    %c0_i32 = arith.constant 0 : i32
    %c0_i32_0 = arith.constant 0 : i32
    %c0_i32_1 = arith.constant 0 : i32
    return %arg0, %c0_i32, %c0_i32_0 : i32, i32, i32
  }
}

</mosaic_0001>

<bundles_post_ra>
// kernel: tpu_custom_call.1
= control target key start
LH: loop header
LB: loop body
LE: loop exit
PB: predicated region body
PF: predicated region fallthrough
CT: control target
= control target key end

     0   :  { %8 = vsyncpa [#allocation3], 0  ;;  %s185_s0 = inlined_call_operand.vmem [shape: f32[8,32], index: 0, kind: input, shape index: {}]   ;;  %s186_s1 = inlined_call_operand.hbm [shape: f32[8,32], index: 1, kind: input, shape index: {}]   ;;  %s187_s2 = inlined_call_operand.vmem [shape: f32[8,1], index: 2, kind: input, shape index: {}]   ;;  %s188_s3 = inlined_call_operand.hbm [shape: f32[1,8,128], index: 3, kind: output, shape index: {}]  }
   0x1   :  { %9 = vsyncpa [#allocation4], 0  ;;  %s133_s12 = smov [#allocation2]   ;;  %s85_s16 = scalar_lea.hbm %s186_s1, 128 }
   0x2   :  { %s18_s13 = sshll.u32 %s133_s12, 4  ;;  %p86_p0 = scmp.ne.s32.totalorder %s186_s1, %s85_s16  ;;  %s19_s13 = int_to_ptr.vmem [resolvable:$true] %s18_s13 }
   0x3   :  { %p89_p1 = scmp.lt.u32.totalorder %s85_s16, %s186_s1 }
   0x5   :  { %p91_p2 = pnand %p89_p1, %p86_p0 }
   0x7   :  { %94 = shalt.err (!%p91_p2)
}
   0x8   :  { %s95_s21 = scalar_lea.vmem %s19_s13, 128  ;;  %p100_p4 = scmp.lt.s32.totalorder %s19_s13, %s19_s13 }
   0x9   :  { %p96_p3 = scmp.ne.s32.totalorder %s19_s13, %s95_s21  ;;  %p101_p5 = scmp.lt.s32.totalorder %s95_s21, %s95_s21 }
   0xb   :  { %p102_p6 = por %p101_p5, %p100_p4 }
   0xd   :  { %p103_p7 = pnand %p102_p6, %p96_p3 }
   0xf   :  { %106 = shalt.err (!%p103_p7)
}
  0x10   :  { %21 = dma.hbm_to_vmem [thread:$0]  %s186_s1, 128, %s19_s13, [#allocation3]  }
  0x11   :  { %129 = dma.done.wait [#allocation3], 128  }
  0x12   :  { %130 = vsyncadd [#allocation3], 4294967168  ;;  %v27_v0 = vld [vmem:[%s185_s0] sm:$0xff]  ;;  %vm32_vm0 = vcmask 261120   ;;  %vm51_vm3 = vcmask 7168   ;;  %s134_s0 = smov [#allocation5]  }
  0x13   :  { %v28_v1 = vld [vmem:[#allocation2] sm:$0xff]  ;;  %s70_s27 = sshll.u32 %s134_s0, 4  ;;  %s71_s27 = int_to_ptr.vmem [resolvable:$true] %s70_s27 }
  0x14   :  { %v29_v2 = vsub.f32 %v27_v0, %v28_v1  ;;  %v43_v13 = vld [vmem:[%s187_s2] sm:$0xff]  ;;  %s107_s28 = scalar_lea.vmem %s71_s27, 128  ;;  %p112_p9 = scmp.lt.s32.totalorder %s71_s27, %s71_s27 }
  0x15   :  { %v47_v15 = vsub.f32 1.0, %v43_v13  ;;  %p108_p8 = scmp.ne.s32.totalorder %s71_s27, %s107_s28  ;;  %p113_p10 = scmp.lt.s32.totalorder %s107_s28, %s107_s28 }
  0x16   :  { %v30_v3 = vadd.f32 1e-06, %v29_v2 }
  0x17   :  { %p114_p11 = por %p113_p10, %p112_p9 }
  0x18   :  { %v31_v4 = vmul.f32 %v30_v3, %v30_v3 }
  0x19   :  { %p115_p12 = pnand %p114_p11, %p108_p8 }
  0x1a   :  { %v33_v5 = vsel %vm32_vm0, %v31_v4, 0.0 }
  0x1b   :  { %34 = vadd.xlane.f32.xlu0 %v33_v5 }
  0xa8   :  { %v35_v6 = vpop.xlane.xlu0 %34 }
  0xa9   :  { %83 = vrsqrt.f32 %v35_v6  ;;  %vm38_vm1 = vcmp.eq.f32.partialorder %v35_v6, inf  ;;  %v41_v9 = vand.u32 2147483648, %v35_v6  ;;  %vm40_vm2 = vcmp.eq.f32.partialorder %v35_v6, 0.0 }
  0xaa   :  { %v46_v17 = vmul.f32 %v43_v13, %v35_v6 }
  0xb3   :  { %v84_v7 = vpop.eup %83 }
  0xb4   :  { %v37_v8 = vmul.f32 %v84_v7, %v35_v6 }
  0xb6   :  { %v39_v10 = vsel %vm38_vm1, %v35_v6, %v37_v8 }
  0xb7   :  { %v42_v11 = vsel %vm40_vm2, %v41_v9, %v39_v10 }
  0xb8   :  { %v44_v12 = vsub.f32 2.0, %v42_v11 }
  0xba   :  { %v45_v14 = vmax.f32 %v44_v12, 0.0 }
  0xbc   :  { %v48_v16 = vmul.f32 %v45_v14, %v45_v14 }
  0xbe   :  { %v49_v18 = vmul.f32 %v48_v16, %v47_v15 }
  0xc0   :  { %v50_v19 = vadd.f32 %v49_v18, %v46_v17 }
  0xc2   :  { %v52_v20 = vsel %vm51_vm3, %v50_v19, 0.0 }
  0xc3   :  { %53 = vadd.xlane.f32.xlu0 %v52_v20 }
 0x150   :  { %v54_v21 = vpop.xlane.xlu0 %53 }
 0x151   :  { %v55_v22 = vrot.slane %v54_v21, 4 }
 0x153   :  { %v56_v23 = vadd.f32 %v55_v22, %v54_v21 }
 0x155   :  { %v57_v24 = vrot.slane %v56_v23, 2 }
 0x157   :  { %v58_v25 = vadd.f32 %v57_v24, %v56_v23 }
 0x159   :  { %v59_v26 = vrot.slane %v58_v25, 1 }
 0x15b   :  { %v60_v27 = vadd.f32 %v59_v26, %v58_v25 }
 0x15d   :  { %79 = vpush %v60_v27 }
 0x18e   :  { %s80_s2 = spop %79 }
 0x18f   :  { %v62_v28 = vstv %s80_s2 }
 0x190   :  { %63 = vst [vmem:[#allocation5] sm:$0xff] %v62_v28 }
 0x191   :  { %118 = shalt.err (!%p115_p12)
}
 0x192   :  { %s119_s4 = scalar_lea.hbm %s188_s3, 128 }
 0x193   :  { %p120_p13 = scmp.ne.s32.totalorder %s188_s3, %s119_s4  ;;  %p123_p0 = scmp.lt.u32.totalorder %s119_s4, %s188_s3 }
 0x195   :  { %p125_p1 = pnand %p123_p0, %p120_p13 }
 0x197   :  { %128 = shalt.err (!%p125_p1)
}
 0x198   :  { %73 = dma.vmem_to_hbm [thread:$0]  %s71_s27, 128, %s188_s3, [#allocation4]  }
 0x199   :  { %131 = dma.done.wait [#allocation4], 128  }
 0x19a   :  { %132 = vsyncadd [#allocation4], 4294967168 }
 0x19b   :  { %77 = vsyncpa [#allocation3], 1 }
 0x19c   :  { %78 = vsyncpa [#allocation4], 1 }

</bundles_post_ra>
